<compile_context>
chip_gen: v7x
topology: tpu7x:2x2x1
jax: 0.10.0
libtpu: 0.0.40
codegen_flags: <defaults>
</compile_context>

<pallas_src>
import jax
import jax.numpy as jnp
from jax.experimental import pallas as pl
from jax.experimental.pallas import tpu as pltpu


def _pack_conv_weights(w_hwio, W):
    """(3, 3, C, C) HWIO conv weights -> (3, W*C, W*C) per-dy banded matmul weights.

    For each dy, row index = w_in*C + c_in, col index = w_out*C + c_out.  The dx
    taps (and the W-border zero padding) are encoded in the band structure, so the
    kernel only needs dy-shifted rows of the input.
    """
    kh, kw, C, Co = w_hwio.shape
    blocks = []
    for dy in range(kh):
        m = jnp.zeros((W * C, W * Co), w_hwio.dtype)
        for dx in range(kw):
            # sel[p, w] = 1 iff input column p == output column w + (dx - 1).
            # Missing off-band entries at w=0 / w=W-1 realize the zero padding.
            sel = jnp.eye(W, k=1 - dx, dtype=w_hwio.dtype)
            m = m + jnp.einsum("pw,io->piwo", sel, w_hwio[dy, dx]).reshape(W * C, W * Co)
        blocks.append(m)
    return jnp.stack(blocks, axis=0)  # (3, W*C, W*C)


def pack_residual_block_params(w1, b1, w2, b2, W):
    """One-time parameter packing (hoisted out of the per-call path).

    Returns:
      wp: (6, W*C, W*C) f32 — [conv1 dy0, dy1, dy2, conv2 dy0, dy1, dy2]
      bp: (2, 1, W*C)   f32 — lane-tiled biases for conv1/conv2.
    """
    wp = jnp.concatenate(
        [_pack_conv_weights(w1.astype(jnp.float32), W),
         _pack_conv_weights(w2.astype(jnp.float32), W)], axis=0)

    def tile_bias(b):
        return jnp.tile(b.reshape(-1).astype(jnp.float32), W).reshape(1, 1, -1)

    bp = jnp.concatenate([tile_bias(b1), tile_bias(b2)], axis=0)
    return wp, bp


def residual_block(x_nchw, wp, bp, *, images_per_step=None):
    """x_nchw: (B, C, H, W); wp/bp from pack_residual_block_params. Returns NCHW."""
    B, C, H, W = x_nchw.shape
    WC = W * C
    if images_per_step is None:
        images_per_step = B                      # fold the whole batch into one step
    assert B % images_per_step == 0
    G = B // images_per_step                     # grid steps (per-core blocks on v7x)
    M = images_per_step * H                      # matmul M per step

    # NCHW -> NHWC -> lane-dense (B*H, W*C). Row-major reshape is free.
    x = jnp.transpose(x_nchw, (0, 2, 3, 1)).astype(jnp.float32).reshape(B * H, WC)

    def kernel(x_ref, w_ref, b_ref, o_ref, pad_ref):
        # x_ref/o_ref: (M, WC); w_ref: (6, WC, WC); b_ref: (2, 1, WC)
        # pad_ref: (M+2, WC) zero-bordered activation scratch (images stacked).
        zero_row = jnp.zeros((1, WC), jnp.float32)
        pad_ref[0:1, :] = zero_row               # re-zeroed every step: scratch is
        pad_ref[M + 1:M + 2, :] = zero_row       # per-core on v7x megacore.

        # Image-boundary masks over the stacked-batch row dimension (built once).
        row_in_img = jax.lax.broadcasted_iota(jnp.int32, (M, WC), 0) % H
        mask_top = row_in_img != 0               # output row has an in-image row above
        mask_bot = row_in_img != (H - 1)         # output row has an in-image row below

        def conv3x3(a, i):
            # a: (M, WC) activated input (f32), lane-dense; i: 0 (conv1) or 1 (conv2).
            pad_ref[1:M + 1, :] = a
            up = jnp.where(mask_top, pad_ref[0:M, :], 0.0)       # rows m-1 (masked)
            dn = jnp.where(mask_bot, pad_ref[2:M + 2, :], 0.0)   # rows m+1 (masked)
            # NOTE(v6e/v7x): casting up/a/dn and w_ref slices to bf16 here (keeping
            # preferred_element_type=f32) cuts MXU passes ~3x; kept f32 for the
            # strict 1e-3 comparison against the f32 reference.
            y = jnp.dot(up, w_ref[3 * i + 0], preferred_element_type=jnp.float32)
            y = y + jnp.dot(a, w_ref[3 * i + 1], preferred_element_type=jnp.float32)
            y = y + jnp.dot(dn, w_ref[3 * i + 2], preferred_element_type=jnp.float32)
            return y + b_ref[i]                  # (M, WC) + (1, WC) broadcast

        h = conv3x3(jnp.maximum(x_ref[...], 0.0), 0)   # relu -> conv1
        h = conv3x3(jnp.maximum(h, 0.0), 1)            # relu -> conv2
        # Residual add: re-read x_ref (already in VMEM) instead of keeping it live
        # in vregs across both convolutions.
        o_ref[...] = (x_ref[...] + h).astype(o_ref.dtype)

    out = pl.pallas_call(
        kernel,
        out_shape=jax.ShapeDtypeStruct((B * H, WC), jnp.float32),
        grid_spec=pltpu.PrefetchScalarGridSpec(
            num_scalar_prefetch=0,
            grid=(G,),
            in_specs=[
                pl.BlockSpec((M, WC), lambda g: (g, 0)),          # x (lane-dense slab)
                pl.BlockSpec((6, WC, WC), lambda g: (0, 0, 0)),   # packed w1+w2 (grid-invariant)
                pl.BlockSpec((2, 1, WC), lambda g: (0, 0, 0)),    # packed b1+b2 (grid-invariant)
            ],
            out_specs=pl.BlockSpec((M, WC), lambda g: (g, 0)),
            scratch_shapes=[
                pltpu.VMEM((M + 2, WC), jnp.float32),             # H-padded stacked activation
            ],
        ),
        compiler_params=pltpu.CompilerParams(dimension_semantics=("parallel",)),
    )(x, wp, bp)

    out = out.reshape(B, H, W, C)
    return jnp.transpose(out, (0, 3, 1, 2))  # back to NCHW


def _reference(x_nchw, w1, b1, w2, b2):
    """Pure-JAX reference (matches PyTorch conv2d semantics with padding=(1,1))."""
    x = jnp.transpose(x_nchw, (0, 2, 3, 1)).astype(jnp.float32)

    def conv(h, w, b):
        y = jax.lax.conv_general_dilated(
            h, w, window_strides=(1, 1), padding="SAME",
            dimension_numbers=("NHWC", "HWIO", "NHWC"))
        return y + b.reshape(1, 1, 1, -1)

    h = jax.nn.relu(x)
    h = conv(h, w1, b1)
    h = jax.nn.relu(h)
    h = conv(h, w2, b2)
    out = x + h
    return jnp.transpose(out, (0, 3, 1, 2))


if __name__ == "__main__":
    B, C, H, W = 2, 8, 16, 16  # filters = C = 8  ->  W*C = 128 (one vreg of lanes)
    key = jax.random.PRNGKey(0)
    kx, kw1, kb1, kw2, kb2 = jax.random.split(key, 5)

    x = jax.random.normal(kx, (B, C, H, W), dtype=jnp.float32)

    # Deterministic synthetic parameters, kept directly in HWIO (3, 3, C_in, C_out).
    w1 = 0.1 * jax.random.normal(kw1, (3, 3, C, C), dtype=jnp.float32)
    b1 = 0.1 * jax.random.normal(kb1, (1, C), dtype=jnp.float32)
    w2 = 0.1 * jax.random.normal(kw2, (3, 3, C, C), dtype=jnp.float32)
    b2 = 0.1 * jax.random.normal(kb2, (1, C), dtype=jnp.float32)

    # Pack parameters ONCE (outside the per-call path), jit the per-call wrapper.
    wp, bp = pack_residual_block_params(w1, b1, w2, b2, W)
    fwd = jax.jit(residual_block, static_argnames=("images_per_step",))

    out = fwd(x, wp, bp)
    out = jax.block_until_ready(out)

    ref = _reference(x, w1, b1, w2, b2)
    assert out.shape == (B, C, H, W)
    err = float(jnp.max(jnp.abs(out - ref)))
    assert jnp.allclose(out, ref, atol=1e-3, rtol=1e-3), f"mismatch vs reference (max abs err {err})"

    print("KERNEL_OK")
</pallas_src>

<mosaic_0001>
module attributes {stable_mosaic.version = 11 : i64} {
  func.func @kernel(%arg0: i32, %arg1: memref<32x128xf32, #tpu.memory_space<vmem>>, %arg2: memref<6x128x128xf32, #tpu.memory_space<vmem>>, %arg3: memref<2x1x128xf32, #tpu.memory_space<vmem>>, %arg4: memref<32x128xf32, #tpu.memory_space<vmem>>, %arg5: memref<34x128xf32, #tpu.memory_space<vmem>>) attributes {dimension_semantics = [#tpu.dimension_semantics<parallel>], iteration_bounds = array<i64: 1>, scalar_prefetch = 0 : i64, scratch_operands = 1 : i64, tpu.core_type = #tpu.core_type<tc>, window_params = [{transform_indices = @transform_0, window_bounds = array<i64: 32, 128>}, {pipeline_mode = #tpu.pipeline_mode<synchronous>, transform_indices = @transform_1, window_bounds = array<i64: 6, 128, 128>}, {pipeline_mode = #tpu.pipeline_mode<synchronous>, transform_indices = @transform_2, window_bounds = array<i64: 2, 1, 128>}, {transform_indices = @transform_3, window_bounds = array<i64: 32, 128>}]} {
    %cst = arith.constant 0.000000e+00 : f32
    %0 = vector.broadcast %cst : f32 to vector<1x128xf32>
    %c0 = arith.constant 0 : index
    %c0_0 = arith.constant 0 : index
    %1 = vector.load %arg5[%c0, %c0_0] : memref<34x128xf32, #tpu.memory_space<vmem>>, vector<1x128xf32>
    tpu.vector_store %arg5[%c0, %c0_0], %0 {strides = array<i32>} : memref<34x128xf32, #tpu.memory_space<vmem>>, vector<1x128xf32>,
    %c33 = arith.constant 33 : index
    %c0_1 = arith.constant 0 : index
    %2 = vector.load %arg5[%c33, %c0_1] : memref<34x128xf32, #tpu.memory_space<vmem>>, vector<1x128xf32>
    tpu.vector_store %arg5[%c33, %c0_1], %0 {strides = array<i32>} : memref<34x128xf32, #tpu.memory_space<vmem>>, vector<1x128xf32>,
    %3 = tpu.iota {dimensions = array<i32: 0>} : vector<32x128xi32>
    %c16_i32 = arith.constant 16 : i32
    %c0_i32 = arith.constant 0 : i32
    %4 = arith.cmpi eq, %c16_i32, %c0_i32 : i32
    %c1_i32 = arith.constant 1 : i32
    %5 = arith.select %4, %c1_i32, %c16_i32 : i32
    %6 = vector.broadcast %5 : i32 to vector<32x128xi32>
    %7 = arith.remsi %3, %6 : vector<32x128xi32>
    %c0_i32_2 = arith.constant 0 : i32
    %8 = vector.broadcast %c0_i32_2 : i32 to vector<32x128xi32>
    %9 = arith.cmpi ne, %7, %8 : vector<32x128xi32>
    %c0_i32_3 = arith.constant 0 : i32
    %10 = vector.broadcast %c0_i32_3 : i32 to vector<32x128xi32>
    %11 = arith.cmpi slt, %7, %10 : vector<32x128xi32>
    %c0_i32_4 = arith.constant 0 : i32
    %12 = arith.cmpi slt, %5, %c0_i32_4 : i32
    %13 = vector.broadcast %12 : i1 to vector<32x128xi1>
    %14 = vector.broadcast %13 : vector<32x128xi1> to vector<32x128xi1>
    %15 = arith.xori %11, %14 : vector<32x128xi1>
    %16 = arith.andi %15, %9 : vector<32x128xi1>
    %17 = vector.broadcast %5 : i32 to vector<32x128xi32>
    %18 = arith.addi %7, %17 : vector<32x128xi32>
    %19 = arith.select %16, %18, %7 : vector<32x128xi1>, vector<32x128xi32>
    %c0_i32_5 = arith.constant 0 : i32
    %20 = vector.broadcast %c0_i32_5 : i32 to vector<32x128xi32>
    %21 = arith.cmpi ne, %19, %20 : vector<32x128xi32>
    %c15_i32 = arith.constant 15 : i32
    %22 = vector.broadcast %c15_i32 : i32 to vector<32x128xi32>
    %23 = arith.cmpi ne, %19, %22 : vector<32x128xi32>
    %c0_6 = arith.constant 0 : index
    %c0_7 = arith.constant 0 : index
    %24 = vector.load %arg1[%c0_6, %c0_7] : memref<32x128xf32, #tpu.memory_space<vmem>>, vector<32x128xf32>
    %cst_8 = arith.constant 0.000000e+00 : f32
    %25 = vector.broadcast %cst_8 : f32 to vector<32x128xf32>
    %26 = arith.maximumf %24, %25 : vector<32x128xf32>
    %c1 = arith.constant 1 : index
    %c0_9 = arith.constant 0 : index
    %27 = vector.load %arg5[%c1, %c0_9] : memref<34x128xf32, #tpu.memory_space<vmem>>, vector<32x128xf32>
    tpu.vector_store %arg5[%c1, %c0_9], %26 {strides = array<i32>} : memref<34x128xf32, #tpu.memory_space<vmem>>, vector<32x128xf32>,
    %c0_10 = arith.constant 0 : index
    %c0_11 = arith.constant 0 : index
    %28 = vector.load %arg5[%c0_10, %c0_11] : memref<34x128xf32, #tpu.memory_space<vmem>>, vector<32x128xf32>
    %cst_12 = arith.constant 0.000000e+00 : f32
    %29 = vector.broadcast %cst_12 : f32 to vector<32x128xf32>
    %30 = arith.select %21, %28, %29 : vector<32x128xi1>, vector<32x128xf32>
    %c2 = arith.constant 2 : index
    %c0_13 = arith.constant 0 : index
    %31 = vector.load %arg5[%c2, %c0_13] : memref<34x128xf32, #tpu.memory_space<vmem>>, vector<32x128xf32>
    %cst_14 = arith.constant 0.000000e+00 : f32
    %32 = vector.broadcast %cst_14 : f32 to vector<32x128xf32>
    %33 = arith.select %23, %31, %32 : vector<32x128xi1>, vector<32x128xf32>
    %c0_15 = arith.constant 0 : index
    %c0_16 = arith.constant 0 : index
    %c0_17 = arith.constant 0 : index
    %34 = vector.load %arg2[%c0_15, %c0_16, %c0_17] : memref<6x128x128xf32, #tpu.memory_space<vmem>>, vector<1x128x128xf32>
    %35 = vector.shape_cast %34 : vector<1x128x128xf32> to vector<128x128xf32>
    %cst_18 = arith.constant dense<0.000000e+00> : vector<32x128xf32>
    %36 = tpu.matmul %30, %35, %cst_18 {dimension_numbers = #tpu.dot_dimension_numbers<[1], [0], [0], [1], [0, 0, 1, 1], [], []>} : vector<32x128xf32>, vector<128x128xf32>, vector<32x128xf32> -> vector<32x128xf32>
    %c1_19 = arith.constant 1 : index
    %c0_20 = arith.constant 0 : index
    %c0_21 = arith.constant 0 : index
    %37 = vector.load %arg2[%c1_19, %c0_20, %c0_21] : memref<6x128x128xf32, #tpu.memory_space<vmem>>, vector<1x128x128xf32>
    %38 = vector.shape_cast %37 : vector<1x128x128xf32> to vector<128x128xf32>
    %cst_22 = arith.constant dense<0.000000e+00> : vector<32x128xf32>
    %39 = tpu.matmul %26, %38, %cst_22 {dimension_numbers = #tpu.dot_dimension_numbers<[1], [0], [0], [1], [0, 0, 1, 1], [], []>} : vector<32x128xf32>, vector<128x128xf32>, vector<32x128xf32> -> vector<32x128xf32>
    %40 = arith.addf %36, %39 : vector<32x128xf32>
    %c2_23 = arith.constant 2 : index
    %c0_24 = arith.constant 0 : index
    %c0_25 = arith.constant 0 : index
    %41 = vector.load %arg2[%c2_23, %c0_24, %c0_25] : memref<6x128x128xf32, #tpu.memory_space<vmem>>, vector<1x128x128xf32>
    %42 = vector.shape_cast %41 : vector<1x128x128xf32> to vector<128x128xf32>
    %cst_26 = arith.constant dense<0.000000e+00> : vector<32x128xf32>
    %43 = tpu.matmul %33, %42, %cst_26 {dimension_numbers = #tpu.dot_dimension_numbers<[1], [0], [0], [1], [0, 0, 1, 1], [], []>} : vector<32x128xf32>, vector<128x128xf32>, vector<32x128xf32> -> vector<32x128xf32>
    %44 = arith.addf %40, %43 : vector<32x128xf32>
    %c0_27 = arith.constant 0 : index
    %c0_28 = arith.constant 0 : index
    %c0_29 = arith.constant 0 : index
    %45 = vector.load %arg3[%c0_27, %c0_28, %c0_29] : memref<2x1x128xf32, #tpu.memory_space<vmem>>, vector<1x1x128xf32>
    %46 = vector.shape_cast %45 : vector<1x1x128xf32> to vector<1x128xf32>
    %47 = vector.broadcast %46 : vector<1x128xf32> to vector<32x128xf32>
    %48 = arith.addf %44, %47 : vector<32x128xf32>
    %cst_30 = arith.constant 0.000000e+00 : f32
    %49 = vector.broadcast %cst_30 : f32 to vector<32x128xf32>
    %50 = arith.maximumf %48, %49 : vector<32x128xf32>
    %c1_31 = arith.constant 1 : index
    %c0_32 = arith.constant 0 : index
    %51 = vector.load %arg5[%c1_31, %c0_32] : memref<34x128xf32, #tpu.memory_space<vmem>>, vector<32x128xf32>
    tpu.vector_store %arg5[%c1_31, %c0_32], %50 {strides = array<i32>} : memref<34x128xf32, #tpu.memory_space<vmem>>, vector<32x128xf32>,
    %c0_33 = arith.constant 0 : index
    %c0_34 = arith.constant 0 : index
    %52 = vector.load %arg5[%c0_33, %c0_34] : memref<34x128xf32, #tpu.memory_space<vmem>>, vector<32x128xf32>
    %cst_35 = arith.constant 0.000000e+00 : f32
    %53 = vector.broadcast %cst_35 : f32 to vector<32x128xf32>
    %54 = arith.select %21, %52, %53 : vector<32x128xi1>, vector<32x128xf32>
    %c2_36 = arith.constant 2 : index
    %c0_37 = arith.constant 0 : index
    %55 = vector.load %arg5[%c2_36, %c0_37] : memref<34x128xf32, #tpu.memory_space<vmem>>, vector<32x128xf32>
    %cst_38 = arith.constant 0.000000e+00 : f32
    %56 = vector.broadcast %cst_38 : f32 to vector<32x128xf32>
    %57 = arith.select %23, %55, %56 : vector<32x128xi1>, vector<32x128xf32>
    %c3 = arith.constant 3 : index
    %c0_39 = arith.constant 0 : index
    %c0_40 = arith.constant 0 : index
    %58 = vector.load %arg2[%c3, %c0_39, %c0_40] : memref<6x128x128xf32, #tpu.memory_space<vmem>>, vector<1x128x128xf32>
    %59 = vector.shape_cast %58 : vector<1x128x128xf32> to vector<128x128xf32>
    %cst_41 = arith.constant dense<0.000000e+00> : vector<32x128xf32>
    %60 = tpu.matmul %54, %59, %cst_41 {dimension_numbers = #tpu.dot_dimension_numbers<[1], [0], [0], [1], [0, 0, 1, 1], [], []>} : vector<32x128xf32>, vector<128x128xf32>, vector<32x128xf32> -> vector<32x128xf32>
    %c4 = arith.constant 4 : index
    %c0_42 = arith.constant 0 : index
    %c0_43 = arith.constant 0 : index
    %61 = vector.load %arg2[%c4, %c0_42, %c0_43] : memref<6x128x128xf32, #tpu.memory_space<vmem>>, vector<1x128x128xf32>
    %62 = vector.shape_cast %61 : vector<1x128x128xf32> to vector<128x128xf32>
    %cst_44 = arith.constant dense<0.000000e+00> : vector<32x128xf32>
    %63 = tpu.matmul %50, %62, %cst_44 {dimension_numbers = #tpu.dot_dimension_numbers<[1], [0], [0], [1], [0, 0, 1, 1], [], []>} : vector<32x128xf32>, vector<128x128xf32>, vector<32x128xf32> -> vector<32x128xf32>
    %64 = arith.addf %60, %63 : vector<32x128xf32>
    %c5 = arith.constant 5 : index
    %c0_45 = arith.constant 0 : index
    %c0_46 = arith.constant 0 : index
    %65 = vector.load %arg2[%c5, %c0_45, %c0_46] : memref<6x128x128xf32, #tpu.memory_space<vmem>>, vector<1x128x128xf32>
    %66 = vector.shape_cast %65 : vector<1x128x128xf32> to vector<128x128xf32>
    %cst_47 = arith.constant dense<0.000000e+00> : vector<32x128xf32>
    %67 = tpu.matmul %57, %66, %cst_47 {dimension_numbers = #tpu.dot_dimension_numbers<[1], [0], [0], [1], [0, 0, 1, 1], [], []>} : vector<32x128xf32>, vector<128x128xf32>, vector<32x128xf32> -> vector<32x128xf32>
    %68 = arith.addf %64, %67 : vector<32x128xf32>
    %c1_48 = arith.constant 1 : index
    %c0_49 = arith.constant 0 : index
    %c0_50 = arith.constant 0 : index
    %69 = vector.load %arg3[%c1_48, %c0_49, %c0_50] : memref<2x1x128xf32, #tpu.memory_space<vmem>>, vector<1x1x128xf32>
    %70 = vector.shape_cast %69 : vector<1x1x128xf32> to vector<1x128xf32>
    %71 = vector.broadcast %70 : vector<1x128xf32> to vector<32x128xf32>
    %72 = arith.addf %68, %71 : vector<32x128xf32>
    %c0_51 = arith.constant 0 : index
    %c0_52 = arith.constant 0 : index
    %73 = vector.load %arg1[%c0_51, %c0_52] : memref<32x128xf32, #tpu.memory_space<vmem>>, vector<32x128xf32>
    %74 = arith.addf %73, %72 : vector<32x128xf32>
    %c0_53 = arith.constant 0 : index
    %c0_54 = arith.constant 0 : index
    %75 = vector.load %arg4[%c0_53, %c0_54] : memref<32x128xf32, #tpu.memory_space<vmem>>, vector<32x128xf32>
    tpu.vector_store %arg4[%c0_53, %c0_54], %74 {strides = array<i32>} : memref<32x128xf32, #tpu.memory_space<vmem>>, vector<32x128xf32>,
    return
  }
  func.func @transform_0(%arg0: i32) -> (i32, i32) {
    %c0_i32 = arith.constant 0 : i32
    %c0_i32_0 = arith.constant 0 : i32
    return %arg0, %c0_i32 : i32, i32
  }
  func.func @transform_1(%arg0: i32) -> (i32, i32, i32) {
    %c0_i32 = arith.constant 0 : i32
    %c0_i32_0 = arith.constant 0 : i32
    %c0_i32_1 = arith.constant 0 : i32
    %c0_i32_2 = arith.constant 0 : i32
    return %c0_i32, %c0_i32_0, %c0_i32_1 : i32, i32, i32
  }
  func.func @transform_2(%arg0: i32) -> (i32, i32, i32) {
    %c0_i32 = arith.constant 0 : i32
    %c0_i32_0 = arith.constant 0 : i32
    %c0_i32_1 = arith.constant 0 : i32
    %c0_i32_2 = arith.constant 0 : i32
    return %c0_i32, %c0_i32_0, %c0_i32_1 : i32, i32, i32
  }
  func.func @transform_3(%arg0: i32) -> (i32, i32) {
    %c0_i32 = arith.constant 0 : i32
    %c0_i32_0 = arith.constant 0 : i32
    return %arg0, %c0_i32 : i32, i32
  }
}

</mosaic_0001>

<bundles_post_ra>
// kernel: residual_block.1
= control target key start
LH: loop header
LB: loop body
LE: loop exit
PB: predicated region body
PF: predicated region fallthrough
CT: control target
= control target key end

     0   :  { %v1435_v3 = vmov 0.0   ;;  %v16_v44 = vlaneseq  ;;  %s1840_s1 = inlined_call_operand.vmem [shape: f32[6,128,128], index: 1, kind: input, shape index: {}]   ;;  %s1841_s0 = inlined_call_operand.vmem [shape: f32[32,128], index: 0, kind: input, shape index: {}]   ;;  %s1842_s2 = inlined_call_operand.vmem [shape: f32[2,1,128], index: 2, kind: input, shape index: {}]   ;;  %s1843_s3 = inlined_call_operand.vmem [shape: f32[32,128], index: 3, kind: output, shape index: {}]  }
   0x1   :  { %v787_v0 = vld [vmem:[%s1840_s1 + $0x80] sm:$0xff]  ;;  %v788_v1 = vld [vmem:[%s1840_s1 + $0x88] sm:$0xff]  ;;  %v789_v2 = vld [vmem:[%s1840_s1 + $0x90] sm:$0xff]  ;;  %14 = vst [vmem:[#allocation2] sm:$0x1] %v1435_v3 }
   0x2   :  { %15 = vst [vmem:[#allocation2 + $0x21] sm:$0x1] %v1435_v3  ;;  %v1226_v4 = vpack.c.bf16 %v788_v1, %v787_v0  ;;  %v790_v5 = vld [vmem:[%s1840_s1 + $0x98] sm:$0xff]  ;;  %v791_v7 = vld [vmem:[%s1840_s1 + $0xa0] sm:$0xff]  ;;  %v792_v8 = vld [vmem:[%s1840_s1 + $0xa8] sm:$0xff]  ;;  %v1570_v51 = vshrl.u32 %v16_v44, 7 }
   0x3   :  { %v1230_v6 = vpack.c.bf16 %v790_v5, %v789_v2  ;;  %v1234_v9 = vpack.c.bf16 %v792_v8, %v791_v7  ;;  %v1477_v10 = vld [vmem:[%s1841_s0] sm:$0xff]  ;;  %v793_v11 = vld [vmem:[%s1840_s1 + $0xb0] sm:$0xff]  ;;  %v794_v12 = vld [vmem:[%s1840_s1 + $0xb8] sm:$0xff] }
   0x4   :  { %1227 = vmatprep.subr.bf16.mxu0 %v1226_v4  ;;  %v81_v13 = vmax.f32 %v1477_v10, 0.0  ;;  %v1489_v14 = vld [vmem:[%s1841_s0 + $0x8] sm:$0xff]  ;;  %v1238_v16 = vpack.c.bf16 %v794_v12, %v793_v11  ;;  %v795_v17 = vld [vmem:[%s1840_s1 + $0xc0] sm:$0xff]  ;;  %v1503_v19 = vld [vmem:[%s1841_s0 + $0x10] sm:$0xff]  ;;  %v25_v58 = vand.u32 15, %v1570_v51 }
   0x5   :  { %1229 = vmatpush3.bf16.msra.mxu0 %v1226_v4  ;;  %v82_v15 = vmax.f32 %v1489_v14, 0.0  ;;  %v796_v18 = vld [vmem:[%s1840_s1 + $0xc8] sm:$0xff]  ;;  %v83_v20 = vmax.f32 %v1503_v19, 0.0  ;;  %v1509_v21 = vld [vmem:[%s1841_s0 + $0x18] sm:$0xff]  ;;  %v797_v24 = vld [vmem:[%s1840_s1 + $0xd0] sm:$0xff] }
   0x6   :  { %1231 = vmatprep.subr.bf16.mxu0 %v1230_v6  ;;  %85 = vst [vmem:[#allocation2 + $0x1] sm:$0xff] %v81_v13  ;;  %1030 = vmatprep.mubr.f32.mxu0 %v81_v13  ;;  %v84_v22 = vmax.f32 %v1509_v21, 0.0  ;;  %v1242_v23 = vpack.c.bf16 %v796_v18, %v795_v17  ;;  %v798_v25 = vld [vmem:[%s1840_s1 + $0xd8] sm:$0xff]  ;;  %v799_v27 = vld [vmem:[%s1840_s1 + $0xe0] sm:$0xff]  ;;  %v800_v28 = vld [vmem:[%s1840_s1 + $0xe8] sm:$0xff]  ;;  %vm1601_vm0 = vcmp.ne.s32.totalorder %v25_v58, 0 }
   0x7   :  { %86 = vst [vmem:[#allocation2 + $0x9] sm:$0xff] %v82_v15  ;;  %87 = vst [vmem:[#allocation2 + $0x11] sm:$0xff] %v83_v20  ;;  %v1246_v26 = vpack.c.bf16 %v798_v25, %v797_v24  ;;  %v840_v29 = vld [vmem:[%s1840_s1 + $0x200] sm:$0xff]  ;;  %v841_v30 = vld [vmem:[%s1840_s1 + $0x208] sm:$0xff]  ;;  %v1250_v37 = vpack.c.bf16 %v800_v28, %v799_v27 }
   0x8   :  { %88 = vst [vmem:[#allocation2 + $0x19] sm:$0xff] %v84_v22  ;;  %v1322_v31 = vpack.c.bf16 %v841_v30, %v840_v29  ;;  %v842_v32 = vld [vmem:[%s1840_s1 + $0x210] sm:$0xff]  ;;  %v843_v33 = vld [vmem:[%s1840_s1 + $0x218] sm:$0xff]  ;;  %v844_v35 = vld [vmem:[%s1840_s1 + $0x220] sm:$0xff] }
   0x9   :  { %1233 = vmatpush3.bf16.msra.mxu0 %v1230_v6  ;;  %v1326_v34 = vpack.c.bf16 %v843_v33, %v842_v32  ;;  %v845_v36 = vld [vmem:[%s1840_s1 + $0x228] sm:$0xff]  ;;  %v801_v38 = vld [vmem:[%s1840_s1 + $0xf0] sm:$0xff]  ;;  %v802_v39 = vld [vmem:[%s1840_s1 + $0xf8] sm:$0xff] }
   0xa   :  { %1235 = vmatprep.subr.bf16.mxu0 %v1234_v9  ;;  %1323 = vmatprep.subr.bf16.mxu1 %v1322_v31  ;;  %v1330_v40 = vpack.c.bf16 %v845_v36, %v844_v35  ;;  %v846_v41 = vld [vmem:[%s1840_s1 + $0x230] sm:$0xff]  ;;  %v847_v42 = vld [vmem:[%s1840_s1 + $0x238] sm:$0xff]  ;;  %v1254_v43 = vpack.c.bf16 %v802_v39, %v801_v38  ;;  %v105_v45 = vld [vmem:[%s1840_s1] sm:$0xff] }
   0xb   :  { %1325 = vmatpush3.bf16.msra.mxu1 %v1322_v31  ;;  %v106_v46 = vld [vmem:[%s1840_s1 + $0x8] sm:$0xff]  ;;  %v1334_v47 = vpack.c.bf16 %v847_v42, %v846_v41  ;;  %v848_v48 = vld [vmem:[%s1840_s1 + $0x240] sm:$0xff]  ;;  %v107_v52 = vld [vmem:[%s1840_s1 + $0x10] sm:$0xff] }
   0xc   :  { %1327 = vmatprep.subr.bf16.mxu1 %v1326_v34  ;;  %v849_v49 = vld [vmem:[%s1840_s1 + $0x248] sm:$0xff]  ;;  %v1258_v50 = vpack.c.bf16 %v106_v46, %v105_v45  ;;  %v108_v53 = vld [vmem:[%s1840_s1 + $0x18] sm:$0xff]  ;;  %v850_v55 = vld [vmem:[%s1840_s1 + $0x250] sm:$0xff] }
   0xd   :  { %1237 = vmatpush3.bf16.msra.mxu0 %v1234_v9  ;;  %v1338_v54 = vpack.c.bf16 %v849_v49, %v848_v48  ;;  %v851_v56 = vld [vmem:[%s1840_s1 + $0x258] sm:$0xff]  ;;  %v1262_v57 = vpack.c.bf16 %v108_v53, %v107_v52  ;;  %v109_v59 = vld [vmem:[%s1840_s1 + $0x20] sm:$0xff]  ;;  %v110_v60 = vld [vmem:[%s1840_s1 + $0x28] sm:$0xff] }
   0xe   :  { %1239 = vmatprep.subr.bf16.mxu0 %v1238_v16  ;;  %v1342_v61 = vpack.c.bf16 %v851_v56, %v850_v55  ;;  %v852_v62 = vld [vmem:[%s1840_s1 + $0x260] sm:$0xff]  ;;  %v853_v63 = vld [vmem:[%s1840_s1 + $0x268] sm:$0xff]  ;;  %v1266_v0 = vpack.c.bf16 %v110_v60, %v109_v59  ;;  %v111_v3 = vld [vmem:[%s1840_s1 + $0x30] sm:$0xff] }
   0xf   :  { %1329 = vmatpush3.bf16.msra.mxu1 %v1326_v34  ;;  %v89_v2 = vld [vmem:[#allocation2] sm:$0xff]  ;;  %v112_v4 = vld [vmem:[%s1840_s1 + $0x38] sm:$0xff]  ;;  %v1346_v5 = vpack.c.bf16 %v853_v63, %v852_v62  ;;  %v114_v8 = vld [vmem:[%s1840_s1 + $0x48] sm:$0xff] }
  0x10   :  { %1331 = vmatprep.subr.bf16.mxu1 %v1330_v40  ;;  %v1270_v6 = vpack.c.bf16 %v112_v4, %v111_v3  ;;  %v113_v7 = vld [vmem:[%s1840_s1 + $0x40] sm:$0xff]  ;;  %v115_v11 = vld [vmem:[%s1840_s1 + $0x50] sm:$0xff]  ;;  %v116_v12 = vld [vmem:[%s1840_s1 + $0x58] sm:$0xff] }
  0x11   :  { %1241 = vmatpush3.bf16.msra.mxu0 %v1238_v16  ;;  %v1274_v9 = vpack.c.bf16 %v114_v8, %v113_v7  ;;  %v1278_v13 = vpack.c.bf16 %v116_v12, %v115_v11  ;;  %v118_v16 = vld [vmem:[%s1840_s1 + $0x68] sm:$0xff]  ;;  %v119_v18 = vld [vmem:[%s1840_s1 + $0x70] sm:$0xff]  ;;  %v805_v24 = vld [vmem:[%s1840_s1 + $0x100] sm:$0xff] }
  0x12   :  { %1243 = vmatprep.subr.bf16.mxu0 %v1242_v23  ;;  %v806_v25 = vld [vmem:[%s1840_s1 + $0x108] sm:$0xff]  ;;  %v807_v28 = vld [vmem:[%s1840_s1 + $0x110] sm:$0xff]  ;;  %v808_v29 = vld [vmem:[%s1840_s1 + $0x118] sm:$0xff] }
  0x13   :  { %1333 = vmatpush3.bf16.msra.mxu1 %v1330_v40  ;;  %v90_v30 = vld [vmem:[#allocation2 + $0x8] sm:$0xff]  ;;  %v1294_v31 = vpack.c.bf16 %v808_v29, %v807_v28  ;;  %v91_v33 = vld [vmem:[#allocation2 + $0x10] sm:$0xff]  ;;  %v809_v34 = vld [vmem:[%s1840_s1 + $0x120] sm:$0xff] }
  0x14   :  { %1335 = vmatprep.subr.bf16.mxu1 %v1334_v47  ;;  %v810_v35 = vld [vmem:[%s1840_s1 + $0x128] sm:$0xff]  ;;  %v92_v36 = vld [vmem:[#allocation2 + $0x18] sm:$0xff]  ;;  %v811_v39 = vld [vmem:[%s1840_s1 + $0x130] sm:$0xff] }
  0x15   :  { %1245 = vmatpush3.bf16.msra.mxu0 %v1242_v23  ;;  %v19_v23 = vadd.s32 16, %v1570_v51  ;;  %v97_v38 = vld [vmem:[#allocation2 + $0x2] sm:$0xff]  ;;  %v812_v40 = vld [vmem:[%s1840_s1 + $0x138] sm:$0xff]  ;;  %v815_v45 = vld [vmem:[%s1840_s1 + $0x150] sm:$0xff] }
  0x16   :  { %1247 = vmatprep.subr.bf16.mxu0 %v1246_v26  ;;  %v1302_v41 = vpack.c.bf16 %v812_v40, %v811_v39  ;;  %v813_v42 = vld [vmem:[%s1840_s1 + $0x140] sm:$0xff]  ;;  %v816_v46 = vld [vmem:[%s1840_s1 + $0x158] sm:$0xff]  ;;  %v818_v49 = vld [vmem:[%s1840_s1 + $0x168] sm:$0xff] }
  0x17   :  { %1337 = vmatpush3.bf16.msra.mxu1 %v1334_v47  ;;  %v39_v27 = vand.u32 15, %v19_v23  ;;  %v1310_v47 = vpack.c.bf16 %v816_v46, %v815_v45  ;;  %v817_v48 = vld [vmem:[%s1840_s1 + $0x160] sm:$0xff]  ;;  %v819_v52 = vld [vmem:[%s1840_s1 + $0x170] sm:$0xff]  ;;  %v820_v53 = vld [vmem:[%s1840_s1 + $0x178] sm:$0xff] }
  0x18   :  { %1339 = vmatprep.subr.bf16.mxu1 %v1338_v54  ;;  %v1318_v55 = vpack.c.bf16 %v820_v53, %v819_v52  ;;  %v98_v59 = vld [vmem:[#allocation2 + $0xa] sm:$0xff]  ;;  %v100_v63 = vld [vmem:[#allocation2 + $0x1a] sm:$0xff] }
  0x19   :  { %1249 = vmatpush3.bf16.msra.mxu0 %v1246_v26  ;;  %v1290_v26 = vpack.c.bf16 %v806_v25, %v805_v24  ;;  %vm1652_vm1 = vcmp.ne.s32.totalorder %v39_v27, 0  ;;  %v824_v3 = vld [vmem:[%s1840_s1 + $0x180] sm:$0xff]  ;;  %v825_v4 = vld [vmem:[%s1840_s1 + $0x188] sm:$0xff]  ;;  %v826_v12 = vld [vmem:[%s1840_s1 + $0x190] sm:$0xff] }
  0x1a   :  { %1251 = vmatprep.subr.bf16.mxu0 %v1250_v37  ;;  %v828_v24 = vld [vmem:[%s1840_s1 + $0x1a0] sm:$0xff]  ;;  %v829_v25 = vld [vmem:[%s1840_s1 + $0x1a8] sm:$0xff]  ;;  %v830_v29 = vld [vmem:[%s1840_s1 + $0x1b0] sm:$0xff] }
  0x1b   :  { %1341 = vmatpush3.bf16.msra.mxu1 %v1338_v54  ;;  %v18_v54 = vadd.s32 8, %v1570_v51  ;;  %v1362_v28 = vpack.c.bf16 %v829_v25, %v828_v24  ;;  %v835_v1 = vld [vmem:[%s1840_s1 + $0x1d8] sm:$0xff]  ;;  %v836_v39 = vld [vmem:[%s1840_s1 + $0x1e0] sm:$0xff]  ;;  %v837_v40 = vld [vmem:[%s1840_s1 + $0x1e8] sm:$0xff] }
  0x1c   :  { %1343 = vmatprep.subr.bf16.mxu1 %v1342_v61  ;;  %v858_v45 = vld [vmem:[%s1840_s1 + $0x280] sm:$0xff]  ;;  %v859_v46 = vld [vmem:[%s1840_s1 + $0x288] sm:$0xff] }
  0x1d   :  { %1253 = vmatpush3.bf16.msra.mxu0 %v1250_v37  ;;  %v1298_v37 = vpack.c.bf16 %v810_v35, %v809_v34  ;;  %v32_v56 = vand.u32 15, %v18_v54  ;;  %v832_v34 = vld [vmem:[%s1840_s1 + $0x1c0] sm:$0xff]  ;;  %v833_v35 = vld [vmem:[%s1840_s1 + $0x1c8] sm:$0xff] }
  0x1e   :  { %1255 = vmatprep.subr.bf16.mxu0 %v1254_v43  ;;  %v862_v53 = vld [vmem:[%s1840_s1 + $0x2a0] sm:$0xff]  ;;  %v863_v54 = vld [vmem:[%s1840_s1 + $0x2a8] sm:$0xff] }
  0x1f   :  { %1345 = vmatpush3.bf16.msra.mxu1 %v1342_v61  ;;  %vm1696_vm2 = vcmp.ne.s32.totalorder %v32_v56, 15  ;;  %v99_v61 = vld [vmem:[#allocation2 + $0x12] sm:$0xff]  ;;  %v1394_v56 = vpack.c.bf16 %v863_v54, %v862_v53  ;;  %v866_v32 = vld [vmem:[%s1840_s1 + $0x2c0] sm:$0xff] }
  0x20   :  { %1347 = vmatprep.subr.bf16.mxu1 %v1346_v5 }
  0x21   :  { %1257 = vmatpush3.bf16.msra.mxu0 %v1254_v43  ;;  %v814_v43 = vld [vmem:[%s1840_s1 + $0x148] sm:$0xff] }
  0x22   :  { %1259 = vmatprep.subr.bf16.mxu0 %v1258_v50  ;;  %v1306_v44 = vpack.c.bf16 %v814_v43, %v813_v42  ;;  %v838_v42 = vld [vmem:[%s1840_s1 + $0x1f0] sm:$0xff]  ;;  %v839_v43 = vld [vmem:[%s1840_s1 + $0x1f8] sm:$0xff] }
  0x23   :  { %1349 = vmatpush3.bf16.msra.mxu1 %v1346_v5  ;;  %v1354_v5 = vpack.c.bf16 %v825_v4, %v824_v3  ;;  %v869_v3 = vld [vmem:[%s1840_s1 + $0x2d8] sm:$0xff] }
  0x24   :  { %1031 = vmatmul.mubr.f32.vlgmr.msra.gmra.mrb[0].mxu0 %v82_v15  ;;  %v117_v15 = vld [vmem:[%s1840_s1 + $0x60] sm:$0xff] }
  0x25   :  { %1261 = vmatpush3.bf16.msra.mxu0 %v1258_v50  ;;  %1033 = vmatprep.mubr.f32.mxu0 %v83_v20  ;;  %v1282_v17 = vpack.c.bf16 %v118_v16, %v117_v15  ;;  %v120_v20 = vld [vmem:[%s1840_s1 + $0x78] sm:$0xff]  ;;  %v1314_v50 = vpack.c.bf16 %v818_v49, %v817_v48  ;;  %v860_v48 = vld [vmem:[%s1840_s1 + $0x290] sm:$0xff] }
  0x26   :  { %1263 = vmatprep.subr.bf16.mxu0 %v1262_v57  ;;  %v861_v49 = vld [vmem:[%s1840_s1 + $0x298] sm:$0xff] }
  0x28   :  { %1034 = vmatmul.mubr.f32.gmra.mrb[2].mxu0 %v84_v22  ;;  %v1286_v22 = vpack.c.bf16 %v120_v20, %v119_v18 }
  0x29   :  { %1265 = vmatpush3.bf16.msra.mxu0 %v1262_v57  ;;  %1068 = vmatprep.mubr.msk.f32.mxu0 %vm1601_vm0, %v89_v2  ;;  %v20_v57 = vadd.s32 24, %v1570_v51  ;;  %v854_v51 = vld [vmem:[%s1840_s1 + $0x270] sm:$0xff] }
  0x2a   :  { %1267 = vmatprep.subr.bf16.mxu0 %v1266_v0 }
  0x2b   :  { %v46_v60 = vand.u32 15, %v20_v57 }
  0x2d   :  { %1269 = vmatpush3.bf16.msra.mxu0 %v1266_v0  ;;  %vm1702_vm3 = vcmp.ne.s32.totalorder %v46_v60, 15  ;;  %v855_v0 = vld [vmem:[%s1840_s1 + $0x278] sm:$0xff] }
  0x2e   :  { %1271 = vmatprep.subr.bf16.mxu0 %v1270_v6  ;;  %v1350_v2 = vpack.c.bf16 %v855_v0, %v854_v51  ;;  %v865_v60 = vld [vmem:[%s1840_s1 + $0x2b8] sm:$0xff]  ;;  %v867_v51 = vld [vmem:[%s1840_s1 + $0x2c8] sm:$0xff] }
  0x2f   :  { %v1402_v0 = vpack.c.bf16 %v867_v51, %v866_v32 }
  0x30   :  { %1351 = vmatprep.subr.bf16.mxu1 %v1350_v2 }
  0x31   :  { %1273 = vmatpush3.bf16.msra.mxu0 %v1270_v6  ;;  %1353 = vmatpush3.bf16.msra.mxu1 %v1350_v2  ;;  %v823_v6 = vld [vmem:[%s1842_s2] ss:$0 sm:$0xff]  ;;  %v868_v2 = vld [vmem:[%s1840_s1 + $0x2d0] sm:$0xff] }
  0x32   :  { %1275 = vmatprep.subr.bf16.mxu0 %v1274_v9  ;;  %1355 = vmatprep.subr.bf16.mxu1 %v1354_v5  ;;  %v1406_v4 = vpack.c.bf16 %v869_v3, %v868_v2 }
  0x35   :  { %1277 = vmatpush3.bf16.msra.mxu0 %v1274_v9 }
  0x36   :  { %1279 = vmatprep.subr.bf16.mxu0 %v1278_v13 }
  0x39   :  { %1281 = vmatpush3.bf16.msra.mxu0 %v1278_v13  ;;  %v827_v13 = vld [vmem:[%s1840_s1 + $0x198] sm:$0xff] }
  0x3a   :  { %1283 = vmatprep.subr.bf16.mxu0 %v1282_v17 }
  0x3d   :  { %1285 = vmatpush3.bf16.msra.mxu0 %v1282_v17 }
  0x3e   :  { %1287 = vmatprep.subr.bf16.mxu0 %v1286_v22 }
  0x41   :  { %1289 = vmatpush3.bf16.msra.mxu0 %v1286_v22  ;;  %v1358_v22 = vpack.c.bf16 %v827_v13, %v826_v12 }
  0x42   :  { %1291 = vmatprep.subr.bf16.mxu0 %v1290_v26 }
  0x44   :  { %1069 = vmatmul.mubr.f32.vlgmr.msra.gmra.mrb[0].mxu0 %v90_v30  ;;  %v831_v30 = vld [vmem:[%s1840_s1 + $0x1b8] sm:$0xff] }
  0x45   :  { %1293 = vmatpush3.bf16.msra.mxu0 %v1290_v26  ;;  %1071 = vmatprep.mubr.msk.f32.mxu0 %vm1652_vm1, %v91_v33  ;;  %v1366_v33 = vpack.c.bf16 %v831_v30, %v830_v29 }
  0x46   :  { %1295 = vmatprep.subr.bf16.mxu0 %v1294_v31 }
  0x48   :  { %1072 = vmatmul.mubr.f32.gmra.mrb[2].mxu0 %v92_v36  ;;  %v1370_v36 = vpack.c.bf16 %v833_v35, %v832_v34 }
  0x49   :  { %1297 = vmatpush3.bf16.msra.mxu0 %v1294_v31  ;;  %1106 = vmatprep.mubr.f32.mxu0 %v97_v38 }
  0x4a   :  { %1299 = vmatprep.subr.bf16.mxu0 %v1298_v37 }
  0x4d   :  { %1301 = vmatpush3.bf16.msra.mxu0 %v1298_v37  ;;  %v834_v37 = vld [vmem:[%s1840_s1 + $0x1d0] sm:$0xff] }
  0x4e   :  { %1303 = vmatprep.subr.bf16.mxu0 %v1302_v41  ;;  %v1374_v38 = vpack.c.bf16 %v835_v1, %v834_v37 }
  0x51   :  { %1305 = vmatpush3.bf16.msra.mxu0 %v1302_v41  ;;  %v1378_v41 = vpack.c.bf16 %v837_v40, %v836_v39 }
  0x52   :  { %1307 = vmatprep.subr.bf16.mxu0 %v1306_v44 }
  0x55   :  { %1309 = vmatpush3.bf16.msra.mxu0 %v1306_v44  ;;  %v1382_v44 = vpack.c.bf16 %v839_v43, %v838_v42 }
  0x56   :  { %1311 = vmatprep.subr.bf16.mxu0 %v1310_v47 }
  0x59   :  { %1313 = vmatpush3.bf16.msra.mxu0 %v1310_v47  ;;  %v1386_v47 = vpack.c.bf16 %v859_v46, %v858_v45 }
  0x5a   :  { %1315 = vmatprep.subr.bf16.mxu0 %v1314_v50 }
  0x5d   :  { %1317 = vmatpush3.bf16.msra.mxu0 %v1314_v50  ;;  %v1390_v50 = vpack.c.bf16 %v861_v49, %v860_v48 }
  0x5e   :  { %1319 = vmatprep.subr.bf16.mxu0 %v1318_v55 }
  0x61   :  { %1321 = vmatpush3.bf16.msra.mxu0 %v1318_v55 }
  0x64   :  { %1107 = vmatmul.mubr.msk.f32.vlgmr.msra.gmra.mrb[0].mxu0 %vm1696_vm2, %v98_v59  ;;  %v864_v59 = vld [vmem:[%s1840_s1 + $0x2b0] sm:$0xff] }
  0x65   :  { %1109 = vmatprep.mubr.f32.mxu0 %v99_v61 }
  0x68   :  { %1110 = vmatmul.mubr.msk.f32.gmra.mrb[2].mxu0 %vm1702_vm3, %v100_v63  ;;  %v1398_v63 = vpack.c.bf16 %v865_v60, %v864_v59 }
 0x137   :  { %v1108_v7 = vpop.f32.mrb[0].mxu0 }
 0x138   :  { %v422_v8 = vadd.f32 %v1108_v7, %v823_v6  ;;  %v391_v9 = vpop.f32.mrb[1].mxu0 }
 0x139   :  { %v421_v11 = vadd.f32 %v823_v6, %v391_v9  ;;  %v873_v9 = vld [vmem:[%s1840_s1 + $0x2f8] sm:$0xff] }
 0x13a   :  { %v426_v15 = vmax.f32 %v422_v8, 0.0  ;;  %v872_v8 = vld [vmem:[%s1840_s1 + $0x2f0] sm:$0xff] }
 0x13b   :  { %v425_v16 = vmax.f32 %v421_v11, 0.0  ;;  %v1111_v17 = vpop.f32.mrb[2].mxu0  ;;  %v1414_v11 = vpack.c.bf16 %v873_v9, %v872_v8 }
 0x13c   :  { %430 = vst [vmem:[#allocation2 + $0x9] sm:$0xff] %v426_v15  ;;  %v424_v18 = vadd.f32 %v1111_v17, %v823_v6  ;;  %v401_v20 = vpop.f32.mrb[3].mxu0 }
 0x13d   :  { %429 = vst [vmem:[#allocation2 + $0x1] sm:$0xff] %v425_v16  ;;  %v423_v23 = vadd.f32 %v823_v6, %v401_v20  ;;  %1144 = vmatprep.mubr.f32.mxu1 %v425_v16  ;;  %v871_v6 = vld [vmem:[%s1840_s1 + $0x2e8] sm:$0xff]  ;;  %v877_v16 = vld [vmem:[%s1842_s2 + $0x1] ss:$0 sm:$0xff] }
 0x13e   :  { %v428_v26 = vmax.f32 %v424_v18, 0.0  ;;  %1145 = vmatmul.mubr.f32.vlgmr.msra.gmra.mrb[0].mxu1 %v426_v15 }
 0x13f   :  { %v427_v27 = vmax.f32 %v423_v23, 0.0  ;;  %1357 = vmatpush3.bf16.msra.mxu1 %v1354_v5  ;;  %v870_v5 = vld [vmem:[%s1840_s1 + $0x2e0] sm:$0xff] }
 0x140   :  { %432 = vst [vmem:[#allocation2 + $0x19] sm:$0xff] %v428_v26  ;;  %1359 = vmatprep.subr.bf16.mxu1 %v1358_v22  ;;  %v1410_v7 = vpack.c.bf16 %v871_v6, %v870_v5 }
 0x141   :  { %431 = vst [vmem:[#allocation2 + $0x11] sm:$0xff] %v427_v27  ;;  %1147 = vmatprep.mubr.f32.mxu1 %v427_v27 }
 0x142   :  { %1148 = vmatmul.mubr.f32.gmra.mrb[2].mxu1 %v428_v26 }
 0x143   :  { %1361 = vmatpush3.bf16.msra.mxu1 %v1358_v22 }
 0x144   :  { %1363 = vmatprep.subr.bf16.mxu1 %v1362_v28  ;;  %v433_v31 = vld [vmem:[#allocation2] sm:$0xff]  ;;  %v434_v52 = vld [vmem:[#allocation2 + $0x8] sm:$0xff] }
 0x145   :  { %1182 = vmatprep.mubr.msk.f32.mxu1 %vm1601_vm0, %v433_v31  ;;  %v441_v61 = vld [vmem:[#allocation2 + $0x2] sm:$0xff] }
 0x147   :  { %1365 = vmatpush3.bf16.msra.mxu1 %v1362_v28  ;;  %v444_v15 = vld [vmem:[#allocation2 + $0x1a] sm:$0xff] }
 0x148   :  { %1367 = vmatprep.subr.bf16.mxu1 %v1366_v33  ;;  %v435_v55 = vld [vmem:[#allocation2 + $0x10] sm:$0xff]  ;;  %v436_v57 = vld [vmem:[#allocation2 + $0x18] sm:$0xff] }
 0x149   :  { %v442_v12 = vld [vmem:[#allocation2 + $0xa] sm:$0xff]  ;;  %v443_v13 = vld [vmem:[#allocation2 + $0x12] sm:$0xff] }
 0x14b   :  { %1369 = vmatpush3.bf16.msra.mxu1 %v1366_v33 }
 0x14c   :  { %1371 = vmatprep.subr.bf16.mxu1 %v1370_v36 }
 0x14f   :  { %1373 = vmatpush3.bf16.msra.mxu1 %v1370_v36 }
 0x150   :  { %1375 = vmatprep.subr.bf16.mxu1 %v1374_v38 }
 0x153   :  { %1377 = vmatpush3.bf16.msra.mxu1 %v1374_v38 }
 0x154   :  { %1379 = vmatprep.subr.bf16.mxu1 %v1378_v41 }
 0x157   :  { %1381 = vmatpush3.bf16.msra.mxu1 %v1378_v41 }
 0x158   :  { %1383 = vmatprep.subr.bf16.mxu1 %v1382_v44 }
 0x15b   :  { %1385 = vmatpush3.bf16.msra.mxu1 %v1382_v44 }
 0x15c   :  { %1387 = vmatprep.subr.bf16.mxu1 %v1386_v47 }
 0x15e   :  { %1183 = vmatmul.mubr.f32.vlgmr.msra.gmra.mrb[0].mxu1 %v434_v52 }
 0x15f   :  { %1185 = vmatprep.mubr.msk.f32.mxu1 %vm1652_vm1, %v435_v55  ;;  %1389 = vmatpush3.bf16.msra.mxu1 %v1386_v47 }
 0x160   :  { %1391 = vmatprep.subr.bf16.mxu1 %v1390_v50 }
 0x162   :  { %1186 = vmatmul.mubr.f32.gmra.mrb[2].mxu1 %v436_v57 }
 0x163   :  { %1393 = vmatpush3.bf16.msra.mxu1 %v1390_v50  ;;  %1220 = vmatprep.mubr.f32.mxu1 %v441_v61 }
 0x164   :  { %1395 = vmatprep.subr.bf16.mxu1 %v1394_v56 }
 0x167   :  { %1397 = vmatpush3.bf16.msra.mxu1 %v1394_v56 }
 0x168   :  { %1399 = vmatprep.subr.bf16.mxu1 %v1398_v63 }
 0x16b   :  { %1401 = vmatpush3.bf16.msra.mxu1 %v1398_v63 }
 0x16c   :  { %1403 = vmatprep.subr.bf16.mxu1 %v1402_v0 }
 0x16f   :  { %1405 = vmatpush3.bf16.msra.mxu1 %v1402_v0 }
 0x170   :  { %1407 = vmatprep.subr.bf16.mxu1 %v1406_v4 }
 0x173   :  { %1409 = vmatpush3.bf16.msra.mxu1 %v1406_v4 }
 0x174   :  { %1411 = vmatprep.subr.bf16.mxu1 %v1410_v7 }
 0x177   :  { %1413 = vmatpush3.bf16.msra.mxu1 %v1410_v7 }
 0x178   :  { %1415 = vmatprep.subr.bf16.mxu1 %v1414_v11 }
 0x17b   :  { %1417 = vmatpush3.bf16.msra.mxu1 %v1414_v11 }
 0x17e   :  { %1221 = vmatmul.mubr.msk.f32.vlgmr.msra.gmra.mrb[0].mxu1 %vm1696_vm2, %v442_v12 }
 0x17f   :  { %1223 = vmatprep.mubr.f32.mxu1 %v443_v13 }
 0x182   :  { %1224 = vmatmul.mubr.msk.f32.gmra.mrb[2].mxu1 %vm1702_vm3, %v444_v15 }
 0x251   :  { %v1222_v17 = vpop.f32.mrb[0].mxu1 }
 0x252   :  { %v768_v18 = vadd.f32 %v1222_v17, %v877_v16  ;;  %v736_v20 = vpop.f32.mrb[1].mxu1 }
 0x253   :  { %v767_v22 = vadd.f32 %v877_v16, %v736_v20 }
 0x254   :  { %v776_v23 = vadd.f32 %v768_v18, %v1489_v14 }
 0x255   :  { %v775_v24 = vadd.f32 %v767_v22, %v1477_v10  ;;  %v1225_v58 = vpop.f32.mrb[2].mxu1 }
 0x256   :  { %780 = vst [vmem:[%s1843_s3 + $0x8] sm:$0xff] %v776_v23  ;;  %v770_v25 = vadd.f32 %v1225_v58, %v877_v16  ;;  %v746_v62 = vpop.f32.mrb[3].mxu1 }
 0x257   :  { %779 = vst [vmem:[%s1843_s3] sm:$0xff] %v775_v24  ;;  %v769_v26 = vadd.f32 %v877_v16, %v746_v62 }
 0x258   :  { %v778_v27 = vadd.f32 %v770_v25, %v1509_v21 }
 0x259   :  { %v777_v28 = vadd.f32 %v769_v26, %v1503_v19 }
 0x25a   :  { %782 = vst [vmem:[%s1843_s3 + $0x18] sm:$0xff] %v778_v27 }
 0x25b   :  { %781 = vst [vmem:[%s1843_s3 + $0x10] sm:$0xff] %v777_v28 }

</bundles_post_ra>
